<compile_context>
chip_gen: v6e
topology: v6e:2x2x1
jax: 0.10.0
libtpu: 0.0.40
codegen_flags: <defaults>
</compile_context>

<pallas_src>
import functools

import jax
import jax.numpy as jnp
from jax.experimental import pallas as pl
from jax.experimental.pallas import tpu as pltpu


def _round_up(x: int, m: int) -> int:
    return ((x + m - 1) // m) * m


def _cdiv(a: int, b: int) -> int:
    return -(-a // b)


def _lane_pad(d: int) -> int:
    # Pad a lane (last) dim to a multiple of 128 only when d >= 128 (overhead
    # < 2x, full-width unmasked vst).  Small dims (H=32, C=3 in the demo) use
    # full-dim blocks instead — avoids the ~16x padded MXU work the review
    # flagged at demo scale.
    return _round_up(d, 128) if d >= 128 else d


# ---------------------------------------------------------------------------
# Pallas kernel: classifier head  (x @ W1 + b1) -> ReLU -> (@ W2 + b2)
# ---------------------------------------------------------------------------
def _classifier_kernel(x_ref, w1_ref, b1_ref, w2_ref, b2_ref, o_ref):
    x = x_ref[...]                                                    # (TB, Hp) bf16
    h = jnp.dot(x, w1_ref[...],
                preferred_element_type=jnp.float32) + b1_ref[...]     # (TB, Hp) f32
    h = jnp.maximum(h, 0.0)                                           # ReLU
    h = h.astype(w2_ref.dtype)                                        # bf16 for MXU pass 2
    logits = jnp.dot(h, w2_ref[...],
                     preferred_element_type=jnp.float32) + b2_ref[...]  # (TB, Cp) f32
    o_ref[...] = logits.astype(o_ref.dtype)


@functools.partial(jax.jit, static_argnames=("n_classes", "tb"))
def _classifier_head_padded(x_cls, w1_p, b1_p, w2_p, b2_p, *, n_classes, tb=512):
    """x_cls: (B, H) f32/bf16; weights already padded+cast at init. -> (B, C) f32."""
    B, H = x_cls.shape
    Hpad = w1_p.shape[0]
    Cpad = w2_p.shape[1]
    C = n_classes

    # ---- batch tiling: tight division, >=2 tiles for v7x megacore when large ----
    n_tiles = _cdiv(B, tb)
    if n_tiles == 1 and B >= 256:
        n_tiles = 2                        # give both v7x TensorCores a tile
    if n_tiles == 1:
        TB, Bpad = B, B                    # full-dim block: zero row padding/waste
    else:
        TB = _round_up(_cdiv(B, n_tiles), 16)   # bf16 sublane packing
        Bpad = n_tiles * TB

    # ---- activations: fused cast to bf16; pad only if genuinely required ----
    x_bf = x_cls.astype(jnp.bfloat16)
    if (Bpad, Hpad) != (B, H):
        x_bf = jnp.zeros((Bpad, Hpad), jnp.bfloat16).at[:B, :H].set(x_bf)

    grid = (n_tiles,)

    flops = 2 * Bpad * (Hpad * Hpad + Hpad * Cpad)
    bytes_accessed = (Bpad * Hpad * 2 + w1_p.size * 2 + w2_p.size * 2
                      + b1_p.size * 4 + b2_p.size * 4 + Bpad * Cpad * 4)

    # ---- explicit VMEM budget: 2x weights (double-buffered resident blocks)
    #      + double-buffered x/out tiles + f32 intermediate, with headroom ----
    weight_bytes = w1_p.size * 2 + w2_p.size * 2 + b1_p.size * 4 + b2_p.size * 4
    tile_bytes = TB * Hpad * 2 + TB * Cpad * 4
    h_bytes = TB * Hpad * 4
    footprint = 2 * weight_bytes + 2 * tile_bytes + h_bytes
    vmem_limit = int(min(64 << 20, max(16 << 20, 2 * footprint)))

    out = pl.pallas_call(
        _classifier_kernel,
        out_shape=jax.ShapeDtypeStruct((Bpad, Cpad), jnp.float32),
        grid_spec=pltpu.PrefetchScalarGridSpec(
            num_scalar_prefetch=0,
            grid=grid,
            in_specs=[
                pl.BlockSpec((TB, Hpad), lambda i: (i, 0)),     # activations: tiled over batch
                pl.BlockSpec((Hpad, Hpad), lambda i: (0, 0)),   # W1: resident across grid
                pl.BlockSpec((1, Hpad), lambda i: (0, 0)),      # b1: resident
                pl.BlockSpec((Hpad, Cpad), lambda i: (0, 0)),   # W2: resident
                pl.BlockSpec((1, Cpad), lambda i: (0, 0)),      # b2: resident
            ],
            out_specs=pl.BlockSpec((TB, Cpad), lambda i: (i, 0)),
        ),
        compiler_params=pltpu.CompilerParams(
            dimension_semantics=("parallel",),   # batch blocks shard across TCs
            vmem_limit_bytes=vmem_limit,
        ),
        cost_estimate=pl.CostEstimate(
            flops=flops, transcendentals=0, bytes_accessed=bytes_accessed),
    )(x_bf, w1_p, b1_p, w2_p, b2_p)

    if (Bpad, Cpad) != (B, C):               # slice only when padding was applied
        out = out[:B, :C]
    return out


# ---------------------------------------------------------------------------
# One-time weight preparation (hoisted out of the per-call jitted path)
# ---------------------------------------------------------------------------
def prepare_classifier_head(w1, b1, w2, b2):
    """Pad (only when needed) + cast classifier weights ONCE at init."""
    H = w1.shape[0]
    C = w2.shape[1]
    Hpad, Cpad = _lane_pad(H), _lane_pad(C)

    w1_bf = w1.astype(jnp.bfloat16)
    w2_bf = w2.astype(jnp.bfloat16)
    b1_f = b1.reshape(1, H).astype(jnp.float32)
    b2_f = b2.reshape(1, C).astype(jnp.float32)

    if Hpad != H:
        w1_bf = jnp.zeros((Hpad, Hpad), jnp.bfloat16).at[:H, :H].set(w1_bf)
        b1_f = jnp.zeros((1, Hpad), jnp.float32).at[:, :H].set(b1_f)
        w2_bf = jnp.zeros((Hpad, C), jnp.bfloat16).at[:H, :].set(w2_bf)
    if Cpad != C:
        w2_bf = jnp.zeros((w2_bf.shape[0], Cpad), jnp.bfloat16).at[:, :C].set(w2_bf)
        b2_f = jnp.zeros((1, Cpad), jnp.float32).at[:, :C].set(b2_f)

    return {"w1": w1_bf, "b1": b1_f, "w2": w2_bf, "b2": b2_f, "n_classes": int(C)}


def classifier_head(x_cls, head, *, tb=512):
    return _classifier_head_padded(
        x_cls, head["w1"], head["b1"], head["w2"], head["b2"],
        n_classes=head["n_classes"], tb=tb)


def classifier_head_reference(x_cls, params):
    """Plain fused XLA head (f32) — reference / small-shape fallback."""
    h = jnp.maximum(x_cls @ params["w1"] + params["b1"], 0.0)
    return h @ params["w2"] + params["b2"]


# ---------------------------------------------------------------------------
# Expert forward (glue in plain JAX + Pallas kernel for the classifier head)
# ---------------------------------------------------------------------------
def init_expert_params(key, vocab_size=100, hidden_dim=32, n_classes=3):
    k_emb, k_w1, k_b1, k_w2, k_b2 = jax.random.split(key, 5)
    params = {
        # TODO(synk): stand-in for the pretrained AutoModel word embeddings; the
        # full transformer encoder (attention/FFN stacks from a checkpoint) is
        # not translatable here.
        "embedding": jax.random.normal(k_emb, (vocab_size, hidden_dim),
                                       jnp.float32) * 0.02,
        # classifier = Linear(H, H) -> ReLU -> Linear(H, n_classes)
        # weights stored as (in_features, out_features); a real PyTorch
        # checkpoint (out, in) would need a transpose on load.
        "w1": jax.random.normal(k_w1, (hidden_dim, hidden_dim), jnp.float32)
              * (1.0 / jnp.sqrt(hidden_dim)),
        "b1": jax.random.normal(k_b1, (1, hidden_dim), jnp.float32) * 0.01,
        "w2": jax.random.normal(k_w2, (hidden_dim, n_classes), jnp.float32)
              * (1.0 / jnp.sqrt(hidden_dim)),
        "b2": jax.random.normal(k_b2, (1, n_classes), jnp.float32) * 0.01,
    }
    # One-time pad/cast of the head weights (review: do NOT redo this per call).
    params["head"] = prepare_classifier_head(params["w1"], params["b1"],
                                             params["w2"], params["b2"])
    return params


def expert_forward(params, indices, mask, *, use_pallas=True):
    """Mirrors Expert.forward(indices, mask) -> logits (B, n_classes)."""
    # Backbone stand-in: gather ONLY the CLS row (token 0) — never build the
    # full (B, S, H) last_hidden just to slice it.  HF's attention_mask masks
    # attention scores inside the (untranslated) backbone, not the CLS output,
    # so it is intentionally unused here.
    x_cls = jnp.take(params["embedding"], indices[:, 0], axis=0)   # (B, H)
    del mask
    if use_pallas:
        return classifier_head(x_cls, params["head"])
    # Production dispatch option: at tiny B/H a single XLA fusion is faster
    # than any kernel launch; kept available but the Pallas path is default.
    return classifier_head_reference(x_cls, params)


if __name__ == "__main__":
    B, S, H, C, V = 2, 8, 32, 3, 100

    key = jax.random.PRNGKey(0)
    k_params, k_idx = jax.random.split(key)
    params = init_expert_params(k_params, vocab_size=V, hidden_dim=H, n_classes=C)

    indices = jax.random.randint(k_idx, (B, S), 0, V, dtype=jnp.int32)
    mask = jnp.ones((B, S), dtype=jnp.int32)

    logits = expert_forward(params, indices, mask)          # Pallas head
    jax.block_until_ready(logits)

    ref = expert_forward(params, indices, mask, use_pallas=False)   # f32 reference
    jax.block_until_ready(ref)

    assert logits.shape == (B, C)
    assert logits.dtype == jnp.float32
    assert bool(jnp.all(jnp.isfinite(logits)))
    assert bool(jnp.allclose(logits, ref, atol=1e-2, rtol=1e-2))    # bf16 vs f32
    print("KERNEL_OK")
</pallas_src>

<mosaic_0001>
module attributes {stable_mosaic.version = 11 : i64} {
  func.func @_classifier_kernel(%arg0: i32, %arg1: memref<2x32xbf16, #tpu.memory_space<vmem>>, %arg2: memref<32x32xbf16, #tpu.memory_space<vmem>>, %arg3: memref<1x32xf32, #tpu.memory_space<vmem>>, %arg4: memref<32x3xbf16, #tpu.memory_space<vmem>>, %arg5: memref<1x3xf32, #tpu.memory_space<vmem>>, %arg6: memref<2x3xf32, #tpu.memory_space<vmem>>) attributes {dimension_semantics = [#tpu.dimension_semantics<parallel>], iteration_bounds = array<i64: 1>, scalar_prefetch = 0 : i64, scratch_operands = 0 : i64, tpu.core_type = #tpu.core_type<tc>, window_params = [{transform_indices = @transform_0, window_bounds = array<i64: 2, 32>}, {pipeline_mode = #tpu.pipeline_mode<synchronous>, transform_indices = @transform_1, window_bounds = array<i64: 32, 32>}, {pipeline_mode = #tpu.pipeline_mode<synchronous>, transform_indices = @transform_2, window_bounds = array<i64: 1, 32>}, {pipeline_mode = #tpu.pipeline_mode<synchronous>, transform_indices = @transform_3, window_bounds = array<i64: 32, 3>}, {pipeline_mode = #tpu.pipeline_mode<synchronous>, transform_indices = @transform_4, window_bounds = array<i64: 1, 3>}, {transform_indices = @transform_5, window_bounds = array<i64: 2, 3>}]} {
    %c0 = arith.constant 0 : index
    %c0_0 = arith.constant 0 : index
    %0 = vector.load %arg1[%c0, %c0_0] : memref<2x32xbf16, #tpu.memory_space<vmem>>, vector<2x32xbf16>
    %c0_1 = arith.constant 0 : index
    %c0_2 = arith.constant 0 : index
    %1 = vector.load %arg2[%c0_1, %c0_2] : memref<32x32xbf16, #tpu.memory_space<vmem>>, vector<32x32xbf16>
    %cst = arith.constant dense<0.000000e+00> : vector<2x32xf32>
    %2 = tpu.matmul %0, %1, %cst {dimension_numbers = #tpu.dot_dimension_numbers<[1], [0], [0], [1], [0, 0, 1, 1], [], []>} : vector<2x32xbf16>, vector<32x32xbf16>, vector<2x32xf32> -> vector<2x32xf32>
    %c0_3 = arith.constant 0 : index
    %c0_4 = arith.constant 0 : index
    %3 = vector.load %arg3[%c0_3, %c0_4] : memref<1x32xf32, #tpu.memory_space<vmem>>, vector<1x32xf32>
    %4 = vector.broadcast %3 : vector<1x32xf32> to vector<2x32xf32>
    %5 = arith.addf %2, %4 : vector<2x32xf32>
    %cst_5 = arith.constant 0.000000e+00 : f32
    %6 = vector.broadcast %cst_5 : f32 to vector<2x32xf32>
    %7 = arith.maximumf %5, %6 : vector<2x32xf32>
    %8 = arith.truncf %7 : vector<2x32xf32> to vector<2x32xbf16>
    %c0_6 = arith.constant 0 : index
    %c0_7 = arith.constant 0 : index
    %9 = vector.load %arg4[%c0_6, %c0_7] : memref<32x3xbf16, #tpu.memory_space<vmem>>, vector<32x3xbf16>
    %cst_8 = arith.constant dense<0.000000e+00> : vector<2x3xf32>
    %10 = tpu.matmul %8, %9, %cst_8 {dimension_numbers = #tpu.dot_dimension_numbers<[1], [0], [0], [1], [0, 0, 1, 1], [], []>} : vector<2x32xbf16>, vector<32x3xbf16>, vector<2x3xf32> -> vector<2x3xf32>
    %c0_9 = arith.constant 0 : index
    %c0_10 = arith.constant 0 : index
    %11 = vector.load %arg5[%c0_9, %c0_10] : memref<1x3xf32, #tpu.memory_space<vmem>>, vector<1x3xf32>
    %12 = vector.broadcast %11 : vector<1x3xf32> to vector<2x3xf32>
    %13 = arith.addf %10, %12 : vector<2x3xf32>
    %c0_11 = arith.constant 0 : index
    %c0_12 = arith.constant 0 : index
    %14 = vector.load %arg6[%c0_11, %c0_12] : memref<2x3xf32, #tpu.memory_space<vmem>>, vector<2x3xf32>
    tpu.vector_store %arg6[%c0_11, %c0_12], %13 {strides = array<i32>} : memref<2x3xf32, #tpu.memory_space<vmem>>, vector<2x3xf32>,
    return
  }
  func.func @transform_0(%arg0: i32) -> (i32, i32) {
    %c0_i32 = arith.constant 0 : i32
    %c0_i32_0 = arith.constant 0 : i32
    return %arg0, %c0_i32 : i32, i32
  }
  func.func @transform_1(%arg0: i32) -> (i32, i32) {
    %c0_i32 = arith.constant 0 : i32
    %c0_i32_0 = arith.constant 0 : i32
    %c0_i32_1 = arith.constant 0 : i32
    return %c0_i32, %c0_i32_0 : i32, i32
  }
  func.func @transform_2(%arg0: i32) -> (i32, i32) {
    %c0_i32 = arith.constant 0 : i32
    %c0_i32_0 = arith.constant 0 : i32
    %c0_i32_1 = arith.constant 0 : i32
    return %c0_i32, %c0_i32_0 : i32, i32
  }
  func.func @transform_3(%arg0: i32) -> (i32, i32) {
    %c0_i32 = arith.constant 0 : i32
    %c0_i32_0 = arith.constant 0 : i32
    %c0_i32_1 = arith.constant 0 : i32
    return %c0_i32, %c0_i32_0 : i32, i32
  }
  func.func @transform_4(%arg0: i32) -> (i32, i32) {
    %c0_i32 = arith.constant 0 : i32
    %c0_i32_0 = arith.constant 0 : i32
    %c0_i32_1 = arith.constant 0 : i32
    return %c0_i32, %c0_i32_0 : i32, i32
  }
  func.func @transform_5(%arg0: i32) -> (i32, i32) {
    %c0_i32 = arith.constant 0 : i32
    %c0_i32_0 = arith.constant 0 : i32
    return %arg0, %c0_i32 : i32, i32
  }
}

</mosaic_0001>

<bundles_post_ra>
// kernel: _classifier_head_padded.1
= control target key start
LH: loop header
LB: loop body
LE: loop exit
PB: predicated region body
PF: predicated region fallthrough
CT: control target
= control target key end

     0   :  { %v233_v1 = vmov 0.0   ;;  %vm234_vm0 = vmmov 0   ;;  %s290_s0 = inlined_call_operand.vmem [shape: bf16[2,32], index: 0, kind: input, shape index: {}]   ;;  %s291_s1 = inlined_call_operand.vmem [shape: bf16[32,32], index: 1, kind: input, shape index: {}]   ;;  %s292_s2 = inlined_call_operand.vmem [shape: f32[1,32], index: 2, kind: input, shape index: {}]   ;;  %s293_s3 = inlined_call_operand.vmem [shape: bf16[32,3], index: 3, kind: input, shape index: {}]   ;;  %s294_s4 = inlined_call_operand.vmem [shape: f32[1,3], index: 4, kind: input, shape index: {}]   ;;  %s295_s5 = inlined_call_operand.hbm [shape: f32[2,3], index: 5, kind: output, shape index: {}]  }
   0x1   :  { %v207_v0 = vld [vmem:[%s291_s1 + $0x8] sm:$0xff]   ;;  %188 = vmatprep.subr.bf16.mxu0 %v233_v1  ;;  %196 = vmatprep.subr.bf16.mxu1 %v233_v1  ;;  %v208_v2 = vld [vmem:[%s291_s1] sm:$0xff]  }
   0x2   :  { %189 = vmatpush3.bf16.msra.mxu0 %v207_v0  ;;  %192 = vmatprep.mubr.msk.bf16.mxu0 %vm234_vm0, %v233_v1 }
   0x3   :  { %190 = vmatprep.subr.bf16.mxu0 %v233_v1  ;;  %200 = vmatprep.mubr.msk.bf16.mxu1 %vm234_vm0, %v233_v1 }
   0x4   :  { %10 = vsyncpa [#allocation3], 0  ;;  %v22_v3 = vld [vmem:[%s290_s0] sm:$0x1]  ;;  %vm46_vm1 = vcmask 261120   ;;  %v209_v4 = vld [vmem:[%s293_s3 + $0x8] sm:$0xff]  }
   0x5   :  { %197 = vmatpush3.bf16.msra.mxu1 %v209_v4  ;;  %v210_v5 = vld [vmem:[%s293_s3] sm:$0xff]   ;;  %s235_s30 = smov [#allocation2]   ;;  %vm158_vm2 = vcmask 17408  }
   0x6   :  { %191 = vmatpush3.bf16.msra.mxu0 %v208_v2  ;;  %198 = vmatprep.subr.bf16.mxu1 %v233_v1  ;;  %v174_v6 = vld [vmem:[%s292_s2] ss:$0 sm:$0xff]  ;;  %s166_s6 = sshll.u32 %s235_s30, 4  ;;  %s167_s6 = int_to_ptr.vmem [resolvable:$true] %s166_s6 }
   0x7   :  { %v178_v14 = vld [vmem:[%s294_s4] ss:$0 sm:$0xff]  ;;  %s211_s2 = scalar_lea.vmem %s167_s6, 32  ;;  %p216_p1 = scmp.lt.s32.totalorder %s167_s6, %s167_s6 }
   0x8   :  { %p212_p0 = scmp.ne.s32.totalorder %s167_s6, %s211_s2  ;;  %p217_p2 = scmp.lt.s32.totalorder %s211_s2, %s211_s2 }
   0x9   :  { %193 = vmatmul.mubr.msk.bf16.vlgmr.msra.gmra.mxu0 %vm46_vm1, %v22_v3  ;;  %199 = vmatpush3.bf16.msra.mxu1 %v210_v5 }
   0xa   :  { %p218_p3 = por %p217_p2, %p216_p1 }
   0xc   :  { %p219_p4 = pnand %p218_p3, %p212_p0 }
  0xc9   :  { %v84_v7 = vpop.f32.mrf.mxu0 }
  0xca   :  { %v85_v8 = vadd.f32 %v174_v6, %v84_v7 }
  0xcb   :  { %v194_v9 = vpop.f32.mrf.mxu0 }
  0xcc   :  { %v90_v10 = vmax.f32 %v85_v8, 0.0 }
  0xcd   :  { %v87_v11 = vpop.f32.mrf.mxu0 }
  0xce   :  { %v91_v12 = vpack.c.bf16 %v90_v10, %v90_v10 }
  0xcf   :  { %v195_v13 = vpop.f32.mrf.mxu0 }
  0xd0   :  { %201 = vmatmul.mubr.msk.bf16.vlgmr.msra.gmra.mxu1 %vm46_vm1, %v91_v12 }
 0x190   :  { %v152_v15 = vpop.f32.mrf.mxu1 }
 0x191   :  { %v153_v16 = vadd.f32 %v178_v14, %v152_v15 }
 0x192   :  { %v202_v17 = vpop.f32.mrf.mxu1 }
 0x193   :  { %159 = vst.msk [vmem:[#allocation2] sm:$0x3] %vm158_vm2, %v153_v16 }
 0x194   :  { %v155_v18 = vpop.f32.mrf.mxu1 }
 0x195   :  { %222 = shalt.err (!%p219_p4)
}
 0x196   :  { %169 = dma.vmem_to_hbm [thread:$0]  %s167_s6, 32, %s295_s5, [#allocation3]   ;;  %v203_v19 = vpop.f32.mrf.mxu1 }
 0x197   :  { %231 = dma.done.wait [#allocation3], 32  }
 0x198   :  { %232 = vsyncadd [#allocation3], 4294967264 }
 0x199   :  { %173 = vsyncpa [#allocation3], 1 }

</bundles_post_ra>
